<compile_context>
chip_gen: v5e
topology: v5e:2x2
jax: 0.10.0
libtpu: 0.0.40
codegen_flags: <defaults>
</compile_context>

<pallas_src>
import functools

import jax
import jax.numpy as jnp
from jax.experimental import pallas as pl
from jax.experimental.pallas import tpu as pltpu

_LANE = 128
_ROW_GRAIN = 16   # bf16 packs 2 rows per sublane -> keep row tiles /16
_TM_MAX = 1024    # per-step row tile cap; working set stays far under VMEM


def _round_up(x, m):
    return (x + m - 1) // m * m


def _pad_axis(a, axis, target):
    if a.shape[axis] == target:
        return a
    pad = [(0, 0)] * a.ndim
    pad[axis] = (0, target - a.shape[axis])
    return jnp.pad(a, pad)


# ---------------------------------------------------------------------------
# Kernels: relu(relu(X @ W1 + b1) @ W2 + b2), row-tiled, bf16 operands,
# f32 accumulation, hidden activation kept in vregs, bf16 output.
# ---------------------------------------------------------------------------
def _mlp1_kernel(x_ref, w1_ref, b1_ref, w2_ref, b2_ref, o_ref):
    x = x_ref[...].astype(jnp.bfloat16)                       # in-kernel cast
    h = jnp.dot(x, w1_ref[...], preferred_element_type=jnp.float32)
    hb = jnp.maximum(h + b1_ref[...], 0.0).astype(jnp.bfloat16)
    o = jnp.dot(hb, w2_ref[...], preferred_element_type=jnp.float32)
    o_ref[...] = jnp.maximum(o + b2_ref[...], 0.0).astype(o_ref.dtype)


def _mlp2_kernel(xa_ref, xb_ref, w1a_ref, w1b_ref, b1_ref, w2_ref, b2_ref,
                 o_ref):
    # relu(concat([xa, xb], -1) @ W1 + b1) with the concat folded into two dots.
    xa = xa_ref[...].astype(jnp.bfloat16)
    xb = xb_ref[...].astype(jnp.bfloat16)
    h = jnp.dot(xa, w1a_ref[...], preferred_element_type=jnp.float32)
    h = h + jnp.dot(xb, w1b_ref[...], preferred_element_type=jnp.float32)
    hb = jnp.maximum(h + b1_ref[...], 0.0).astype(jnp.bfloat16)
    o = jnp.dot(hb, w2_ref[...], preferred_element_type=jnp.float32)
    o_ref[...] = jnp.maximum(o + b2_ref[...], 0.0).astype(o_ref.dtype)


def mlp_pallas(x_parts, w1_parts, b1, w2, b2):
    """relu(relu(concat(x_parts, -1) @ concat(w1_parts, 0) + b1) @ w2 + b2).

    x_parts:  list (len 1 or 2) of (rows, k_i) float32 (k_i >= w1_parts[i] K;
              extra lanes must be zero — they are zero-padded lanes upstream)
    w1_parts: list (same len) of (K_i, H) float32
    b1, b2:   (H,) float32;  w2: (H, H) float32
    returns   (rows, h_p) bfloat16, lane-padded to a multiple of 128; the
              padded lanes are exactly zero.
    """
    assert len(x_parts) in (1, 2) and len(x_parts) == len(w1_parts)
    rows = x_parts[0].shape[0]
    H = w2.shape[0]
    h_p = _round_up(H, _LANE)                   # lane-dense hidden/output

    # Row tiling: multiple of 16; >=2 grid steps when enough work so v7x's two
    # TensorCores both get rows; balanced so rows never round up by ~2x.
    rows16 = _round_up(rows, _ROW_GRAIN)
    n_steps = max(pl.cdiv(rows16, _TM_MAX), 2 if rows16 >= 2 * _ROW_GRAIN else 1)
    tm = _round_up(pl.cdiv(rows16, n_steps), _ROW_GRAIN)
    grid = (pl.cdiv(rows, tm),)

    # Weights/biases: small, one-time bf16 cast + zero-pad (K to match x, N to h_p).
    w1s = []
    for x, w in zip(x_parts, w1_parts):
        assert x.shape[1] >= w.shape[0]
        w1s.append(_pad_axis(_pad_axis(w, 0, x.shape[1]), 1, h_p)
                   .astype(jnp.bfloat16))
    w2p = _pad_axis(_pad_axis(w2, 0, h_p), 1, h_p).astype(jnp.bfloat16)
    b1p = _pad_axis(b1.reshape(1, -1).astype(jnp.float32), 1, h_p)
    b2p = _pad_axis(b2.reshape(1, -1).astype(jnp.float32), 1, h_p)

    # X / out tiled over rows; weights & biases resident (constant index_maps).
    x_specs = [pl.BlockSpec((tm, x.shape[1]), lambda i: (i, 0)) for x in x_parts]
    w1_specs = [pl.BlockSpec(w.shape, lambda i: (0, 0)) for w in w1s]
    b_spec = pl.BlockSpec((1, h_p), lambda i: (0, 0))
    w2_spec = pl.BlockSpec((h_p, h_p), lambda i: (0, 0))

    if len(x_parts) == 1:
        kernel = _mlp1_kernel
        args = (x_parts[0], w1s[0], b1p, w2p, b2p)
        in_specs = [x_specs[0], w1_specs[0], b_spec, w2_spec, b_spec]
    else:
        kernel = _mlp2_kernel
        args = (x_parts[0], x_parts[1], w1s[0], w1s[1], b1p, w2p, b2p)
        in_specs = [x_specs[0], x_specs[1], w1_specs[0], w1_specs[1],
                    b_spec, w2_spec, b_spec]

    out = pl.pallas_call(
        kernel,
        out_shape=jax.ShapeDtypeStruct((rows, h_p), jnp.bfloat16),
        grid=grid,
        in_specs=in_specs,
        out_specs=pl.BlockSpec((tm, h_p), lambda i: (i, 0)),
        compiler_params=pltpu.CompilerParams(
            dimension_semantics=("parallel",)),
    )(*args)
    return out


def mlp_ref(x_parts, w1_parts, b1, w2, b2):
    """Pure-JAX reference with the exact same bf16/f32 math as the kernel."""
    h = None
    for x, w in zip(x_parts, w1_parts):
        xb = x[:, :w.shape[0]].astype(jnp.bfloat16)
        d = jnp.dot(xb, w.astype(jnp.bfloat16),
                    preferred_element_type=jnp.float32)
        h = d if h is None else h + d
    hb = jnp.maximum(h + b1.reshape(1, -1), 0.0).astype(jnp.bfloat16)
    o = jnp.dot(hb, w2.astype(jnp.bfloat16), preferred_element_type=jnp.float32)
    return jnp.maximum(o + b2.reshape(1, -1), 0.0).astype(jnp.bfloat16)


# ---------------------------------------------------------------------------
# Full DecomposableAttention forward.
# ---------------------------------------------------------------------------
def _forward(premises, hypotheses, params, mlp_fn):
    emb = params["embedding"]
    A = jnp.take(emb, premises, axis=0)          # (bsz, slen, d) — gather in JAX
    B = jnp.take(emb, hypotheses, axis=0)
    bsz, slen, d = A.shape
    num_hiddens = params["attend"][3].shape[0]

    # ---- Attend: f_A and f_B fused into one call by stacking rows ----
    w1, b1, w2, b2 = params["attend"]
    AB = jnp.concatenate([A, B], axis=0).reshape(2 * bsz * slen, d)
    f = mlp_fn([AB], [w1], b1, w2, b2)           # (rows, h_p) lane-padded bf16
    f = f.reshape(2 * bsz, slen, f.shape[-1])    # keep padded lanes (zeros)
    f_A, f_B = f[:bsz], f[bsz:]
    scores = jnp.einsum("bqh,bkh->bqk", f_A, f_B,
                        preferred_element_type=jnp.float32)   # e = f_A @ f_B^T
    beta = jnp.einsum("bij,bjd->bid", jax.nn.softmax(scores, axis=-1), B)
    alpha = jnp.einsum("bij,bid->bjd", jax.nn.softmax(scores, axis=1), A)

    # ---- Compare: V_A and V_B fused; torch.cat(dim=2) folded into the kernel ----
    w1, b1, w2, b2 = params["compare"]
    w1a, w1b = w1[:d], w1[d:]
    XB = jnp.concatenate([beta, alpha], axis=0).reshape(2 * bsz * slen, d)
    V = mlp_fn([AB, XB], [w1a, w1b], b1, w2, b2)
    V = V.reshape(2 * bsz, slen, V.shape[-1])
    V_A_p, V_B_p = V[:bsz], V[bsz:]              # lane-padded, padding is zero

    # ---- Aggregate (consumes padded lane-dense sums; zero lanes are inert) ----
    w1, b1, w2, b2 = params["agg_mlp"]
    w1a, w1b = w1[:num_hiddens], w1[num_hiddens:]
    sA = V_A_p.sum(axis=1, dtype=jnp.float32)
    sB = V_B_p.sum(axis=1, dtype=jnp.float32)
    hidden = mlp_fn([sA, sB], [w1a, w1b], b1, w2, b2)
    wl, bl = params["agg_linear"]
    Y_hat = hidden[:, :num_hiddens].astype(jnp.float32) @ wl + bl   # (bsz, 3)
    return Y_hat, V_A_p[..., :num_hiddens], V_B_p[..., :num_hiddens]


# ---------------------------------------------------------------------------
# Parameter init (Kaiming-like scale, deterministic).
# ---------------------------------------------------------------------------
def _init_linear(key, n_in, n_out):
    kw, kb = jax.random.split(key)
    w = jax.random.normal(kw, (n_in, n_out), jnp.float32) * (2.0 / n_in) ** 0.5
    b = jax.random.normal(kb, (n_out,), jnp.float32) * 0.01
    return w, b


def _init_mlp(key, n_in, n_h):
    k1, k2 = jax.random.split(key)
    w1, b1 = _init_linear(k1, n_in, n_h)
    w2, b2 = _init_linear(k2, n_h, n_h)
    return w1, b1, w2, b2


def init_params(key, vocab_size, embed_size, num_hiddens, num_outputs=3):
    k0, k1, k2, k3, k4 = jax.random.split(key, 5)
    return {
        "embedding": jax.random.normal(k0, (vocab_size, embed_size), jnp.float32),
        "attend": _init_mlp(k1, embed_size, num_hiddens),
        "compare": _init_mlp(k2, 2 * embed_size, num_hiddens),
        "agg_mlp": _init_mlp(k3, 2 * num_hiddens, num_hiddens),
        "agg_linear": _init_linear(k4, num_hiddens, num_outputs),
    }


if __name__ == "__main__":
    vocab_size, embed_size, num_hiddens = 64, 16, 32
    batch, seq = 2, 8

    key = jax.random.PRNGKey(0)
    kp, kh, kw = jax.random.split(key, 3)
    premises = jax.random.randint(kp, (batch, seq), 0, vocab_size, dtype=jnp.int32)
    hypotheses = jax.random.randint(kh, (batch, seq), 0, vocab_size, dtype=jnp.int32)
    params = init_params(kw, vocab_size, embed_size, num_hiddens)

    forward_pallas = jax.jit(functools.partial(_forward, mlp_fn=mlp_pallas))
    forward_ref = jax.jit(functools.partial(_forward, mlp_fn=mlp_ref))

    Y_hat, V_A, V_B = forward_pallas(premises, hypotheses, params)
    jax.block_until_ready((Y_hat, V_A, V_B))

    Y_ref, V_A_ref, V_B_ref = forward_ref(premises, hypotheses, params)
    jax.block_until_ready((Y_ref, V_A_ref, V_B_ref))

    assert Y_hat.shape == (batch, 3)
    assert V_A.shape == (batch, seq, num_hiddens)
    assert V_B.shape == (batch, seq, num_hiddens)
    assert jnp.allclose(V_A.astype(jnp.float32), V_A_ref.astype(jnp.float32),
                        atol=1e-2, rtol=1e-2)
    assert jnp.allclose(V_B.astype(jnp.float32), V_B_ref.astype(jnp.float32),
                        atol=1e-2, rtol=1e-2)
    assert jnp.allclose(Y_hat, Y_ref, atol=1e-2, rtol=1e-2)

    print("KERNEL_OK")
</pallas_src>

<mosaic_0001>
module attributes {stable_mosaic.version = 11 : i64} {
  func.func @_mlp1_kernel(%arg0: i32, %arg1: memref<16x16xf32, #tpu.memory_space<vmem>>, %arg2: memref<16x128xbf16, #tpu.memory_space<vmem>>, %arg3: memref<1x128xf32, #tpu.memory_space<vmem>>, %arg4: memref<128x128xbf16, #tpu.memory_space<vmem>>, %arg5: memref<1x128xf32, #tpu.memory_space<vmem>>, %arg6: memref<16x128xbf16, #tpu.memory_space<vmem>>) attributes {dimension_semantics = [#tpu.dimension_semantics<parallel>], iteration_bounds = array<i64: 2>, scalar_prefetch = 0 : i64, scratch_operands = 0 : i64, tpu.core_type = #tpu.core_type<tc>, window_params = [{transform_indices = @transform_0, window_bounds = array<i64: 16, 16>}, {pipeline_mode = #tpu.pipeline_mode<synchronous>, transform_indices = @transform_1, window_bounds = array<i64: 16, 128>}, {pipeline_mode = #tpu.pipeline_mode<synchronous>, transform_indices = @transform_2, window_bounds = array<i64: 1, 128>}, {pipeline_mode = #tpu.pipeline_mode<synchronous>, transform_indices = @transform_3, window_bounds = array<i64: 128, 128>}, {pipeline_mode = #tpu.pipeline_mode<synchronous>, transform_indices = @transform_4, window_bounds = array<i64: 1, 128>}, {transform_indices = @transform_5, window_bounds = array<i64: 16, 128>}]} {
    %c0 = arith.constant 0 : index
    %c0_0 = arith.constant 0 : index
    %0 = vector.load %arg1[%c0, %c0_0] : memref<16x16xf32, #tpu.memory_space<vmem>>, vector<16x16xf32>
    %1 = arith.truncf %0 : vector<16x16xf32> to vector<16x16xbf16>
    %c0_1 = arith.constant 0 : index
    %c0_2 = arith.constant 0 : index
    %2 = vector.load %arg2[%c0_1, %c0_2] : memref<16x128xbf16, #tpu.memory_space<vmem>>, vector<16x128xbf16>
    %cst = arith.constant dense<0.000000e+00> : vector<16x128xf32>
    %3 = tpu.matmul %1, %2, %cst {dimension_numbers = #tpu.dot_dimension_numbers<[1], [0], [0], [1], [0, 0, 1, 1], [], []>} : vector<16x16xbf16>, vector<16x128xbf16>, vector<16x128xf32> -> vector<16x128xf32>
    %c0_3 = arith.constant 0 : index
    %c0_4 = arith.constant 0 : index
    %4 = vector.load %arg3[%c0_3, %c0_4] : memref<1x128xf32, #tpu.memory_space<vmem>>, vector<1x128xf32>
    %5 = vector.broadcast %4 : vector<1x128xf32> to vector<16x128xf32>
    %6 = arith.addf %3, %5 : vector<16x128xf32>
    %cst_5 = arith.constant 0.000000e+00 : f32
    %7 = vector.broadcast %cst_5 : f32 to vector<16x128xf32>
    %8 = arith.maximumf %6, %7 : vector<16x128xf32>
    %9 = arith.truncf %8 : vector<16x128xf32> to vector<16x128xbf16>
    %c0_6 = arith.constant 0 : index
    %c0_7 = arith.constant 0 : index
    %10 = vector.load %arg4[%c0_6, %c0_7] : memref<128x128xbf16, #tpu.memory_space<vmem>>, vector<128x128xbf16>
    %cst_8 = arith.constant dense<0.000000e+00> : vector<16x128xf32>
    %11 = tpu.matmul %9, %10, %cst_8 {dimension_numbers = #tpu.dot_dimension_numbers<[1], [0], [0], [1], [0, 0, 1, 1], [], []>} : vector<16x128xbf16>, vector<128x128xbf16>, vector<16x128xf32> -> vector<16x128xf32>
    %c0_9 = arith.constant 0 : index
    %c0_10 = arith.constant 0 : index
    %12 = vector.load %arg5[%c0_9, %c0_10] : memref<1x128xf32, #tpu.memory_space<vmem>>, vector<1x128xf32>
    %13 = vector.broadcast %12 : vector<1x128xf32> to vector<16x128xf32>
    %14 = arith.addf %11, %13 : vector<16x128xf32>
    %cst_11 = arith.constant 0.000000e+00 : f32
    %15 = vector.broadcast %cst_11 : f32 to vector<16x128xf32>
    %16 = arith.maximumf %14, %15 : vector<16x128xf32>
    %17 = arith.truncf %16 : vector<16x128xf32> to vector<16x128xbf16>
    %c0_12 = arith.constant 0 : index
    %c0_13 = arith.constant 0 : index
    %18 = vector.load %arg6[%c0_12, %c0_13] : memref<16x128xbf16, #tpu.memory_space<vmem>>, vector<16x128xbf16>
    tpu.vector_store %arg6[%c0_12, %c0_13], %17 {strides = array<i32>} : memref<16x128xbf16, #tpu.memory_space<vmem>>, vector<16x128xbf16>,
    return
  }
  func.func @transform_0(%arg0: i32) -> (i32, i32) {
    %c0_i32 = arith.constant 0 : i32
    %c0_i32_0 = arith.constant 0 : i32
    return %arg0, %c0_i32 : i32, i32
  }
  func.func @transform_1(%arg0: i32) -> (i32, i32) {
    %c0_i32 = arith.constant 0 : i32
    %c0_i32_0 = arith.constant 0 : i32
    %c0_i32_1 = arith.constant 0 : i32
    return %c0_i32, %c0_i32_0 : i32, i32
  }
  func.func @transform_2(%arg0: i32) -> (i32, i32) {
    %c0_i32 = arith.constant 0 : i32
    %c0_i32_0 = arith.constant 0 : i32
    %c0_i32_1 = arith.constant 0 : i32
    return %c0_i32, %c0_i32_0 : i32, i32
  }
  func.func @transform_3(%arg0: i32) -> (i32, i32) {
    %c0_i32 = arith.constant 0 : i32
    %c0_i32_0 = arith.constant 0 : i32
    %c0_i32_1 = arith.constant 0 : i32
    return %c0_i32, %c0_i32_0 : i32, i32
  }
  func.func @transform_4(%arg0: i32) -> (i32, i32) {
    %c0_i32 = arith.constant 0 : i32
    %c0_i32_0 = arith.constant 0 : i32
    %c0_i32_1 = arith.constant 0 : i32
    return %c0_i32, %c0_i32_0 : i32, i32
  }
  func.func @transform_5(%arg0: i32) -> (i32, i32) {
    %c0_i32 = arith.constant 0 : i32
    %c0_i32_0 = arith.constant 0 : i32
    return %arg0, %c0_i32 : i32, i32
  }
}

module attributes {stable_mosaic.version = 11 : i64} {
  func.func @_mlp2_kernel(%arg0: i32, %arg1: memref<16x128xf32, #tpu.memory_space<vmem>>, %arg2: memref<16x128xf32, #tpu.memory_space<vmem>>, %arg3: memref<128x128xbf16, #tpu.memory_space<vmem>>, %arg4: memref<128x128xbf16, #tpu.memory_space<vmem>>, %arg5: memref<1x128xf32, #tpu.memory_space<vmem>>, %arg6: memref<128x128xbf16, #tpu.memory_space<vmem>>, %arg7: memref<1x128xf32, #tpu.memory_space<vmem>>, %arg8: memref<16x128xbf16, #tpu.memory_space<vmem>>) attributes {dimension_semantics = [#tpu.dimension_semantics<parallel>], iteration_bounds = array<i64: 1>, scalar_prefetch = 0 : i64, scratch_operands = 0 : i64, tpu.core_type = #tpu.core_type<tc>, window_params = [{transform_indices = @transform_0, window_bounds = array<i64: 16, 128>}, {transform_indices = @transform_1, window_bounds = array<i64: 16, 128>}, {pipeline_mode = #tpu.pipeline_mode<synchronous>, transform_indices = @transform_2, window_bounds = array<i64: 128, 128>}, {pipeline_mode = #tpu.pipeline_mode<synchronous>, transform_indices = @transform_3, window_bounds = array<i64: 128, 128>}, {pipeline_mode = #tpu.pipeline_mode<synchronous>, transform_indices = @transform_4, window_bounds = array<i64: 1, 128>}, {pipeline_mode = #tpu.pipeline_mode<synchronous>, transform_indices = @transform_5, window_bounds = array<i64: 128, 128>}, {pipeline_mode = #tpu.pipeline_mode<synchronous>, transform_indices = @transform_6, window_bounds = array<i64: 1, 128>}, {transform_indices = @transform_7, window_bounds = array<i64: 16, 128>}]} {
    %c0 = arith.constant 0 : index
    %c0_0 = arith.constant 0 : index
    %0 = vector.load %arg1[%c0, %c0_0] : memref<16x128xf32, #tpu.memory_space<vmem>>, vector<16x128xf32>
    %1 = arith.truncf %0 : vector<16x128xf32> to vector<16x128xbf16>
    %c0_1 = arith.constant 0 : index
    %c0_2 = arith.constant 0 : index
    %2 = vector.load %arg2[%c0_1, %c0_2] : memref<16x128xf32, #tpu.memory_space<vmem>>, vector<16x128xf32>
    %3 = arith.truncf %2 : vector<16x128xf32> to vector<16x128xbf16>
    %c0_3 = arith.constant 0 : index
    %c0_4 = arith.constant 0 : index
    %4 = vector.load %arg3[%c0_3, %c0_4] : memref<128x128xbf16, #tpu.memory_space<vmem>>, vector<128x128xbf16>
    %cst = arith.constant dense<0.000000e+00> : vector<16x128xf32>
    %5 = tpu.matmul %1, %4, %cst {dimension_numbers = #tpu.dot_dimension_numbers<[1], [0], [0], [1], [0, 0, 1, 1], [], []>} : vector<16x128xbf16>, vector<128x128xbf16>, vector<16x128xf32> -> vector<16x128xf32>
    %c0_5 = arith.constant 0 : index
    %c0_6 = arith.constant 0 : index
    %6 = vector.load %arg4[%c0_5, %c0_6] : memref<128x128xbf16, #tpu.memory_space<vmem>>, vector<128x128xbf16>
    %cst_7 = arith.constant dense<0.000000e+00> : vector<16x128xf32>
    %7 = tpu.matmul %3, %6, %cst_7 {dimension_numbers = #tpu.dot_dimension_numbers<[1], [0], [0], [1], [0, 0, 1, 1], [], []>} : vector<16x128xbf16>, vector<128x128xbf16>, vector<16x128xf32> -> vector<16x128xf32>
    %8 = arith.addf %5, %7 : vector<16x128xf32>
    %c0_8 = arith.constant 0 : index
    %c0_9 = arith.constant 0 : index
    %9 = vector.load %arg5[%c0_8, %c0_9] : memref<1x128xf32, #tpu.memory_space<vmem>>, vector<1x128xf32>
    %10 = vector.broadcast %9 : vector<1x128xf32> to vector<16x128xf32>
    %11 = arith.addf %8, %10 : vector<16x128xf32>
    %cst_10 = arith.constant 0.000000e+00 : f32
    %12 = vector.broadcast %cst_10 : f32 to vector<16x128xf32>
    %13 = arith.maximumf %11, %12 : vector<16x128xf32>
    %14 = arith.truncf %13 : vector<16x128xf32> to vector<16x128xbf16>
    %c0_11 = arith.constant 0 : index
    %c0_12 = arith.constant 0 : index
    %15 = vector.load %arg6[%c0_11, %c0_12] : memref<128x128xbf16, #tpu.memory_space<vmem>>, vector<128x128xbf16>
    %cst_13 = arith.constant dense<0.000000e+00> : vector<16x128xf32>
    %16 = tpu.matmul %14, %15, %cst_13 {dimension_numbers = #tpu.dot_dimension_numbers<[1], [0], [0], [1], [0, 0, 1, 1], [], []>} : vector<16x128xbf16>, vector<128x128xbf16>, vector<16x128xf32> -> vector<16x128xf32>
    %c0_14 = arith.constant 0 : index
    %c0_15 = arith.constant 0 : index
    %17 = vector.load %arg7[%c0_14, %c0_15] : memref<1x128xf32, #tpu.memory_space<vmem>>, vector<1x128xf32>
    %18 = vector.broadcast %17 : vector<1x128xf32> to vector<16x128xf32>
    %19 = arith.addf %16, %18 : vector<16x128xf32>
    %cst_16 = arith.constant 0.000000e+00 : f32
    %20 = vector.broadcast %cst_16 : f32 to vector<16x128xf32>
    %21 = arith.maximumf %19, %20 : vector<16x128xf32>
    %22 = arith.truncf %21 : vector<16x128xf32> to vector<16x128xbf16>
    %c0_17 = arith.constant 0 : index
    %c0_18 = arith.constant 0 : index
    %23 = vector.load %arg8[%c0_17, %c0_18] : memref<16x128xbf16, #tpu.memory_space<vmem>>, vector<16x128xbf16>
    tpu.vector_store %arg8[%c0_17, %c0_18], %22 {strides = array<i32>} : memref<16x128xbf16, #tpu.memory_space<vmem>>, vector<16x128xbf16>,
    return
  }
  func.func @transform_0(%arg0: i32) -> (i32, i32) {
    %c0_i32 = arith.constant 0 : i32
    %c0_i32_0 = arith.constant 0 : i32
    return %arg0, %c0_i32 : i32, i32
  }
  func.func @transform_1(%arg0: i32) -> (i32, i32) {
    %c0_i32 = arith.constant 0 : i32
    %c0_i32_0 = arith.constant 0 : i32
    return %arg0, %c0_i32 : i32, i32
  }
  func.func @transform_2(%arg0: i32) -> (i32, i32) {
    %c0_i32 = arith.constant 0 : i32
    %c0_i32_0 = arith.constant 0 : i32
    %c0_i32_1 = arith.constant 0 : i32
    return %c0_i32, %c0_i32_0 : i32, i32
  }
  func.func @transform_3(%arg0: i32) -> (i32, i32) {
    %c0_i32 = arith.constant 0 : i32
    %c0_i32_0 = arith.constant 0 : i32
    %c0_i32_1 = arith.constant 0 : i32
    return %c0_i32, %c0_i32_0 : i32, i32
  }
  func.func @transform_4(%arg0: i32) -> (i32, i32) {
    %c0_i32 = arith.constant 0 : i32
    %c0_i32_0 = arith.constant 0 : i32
    %c0_i32_1 = arith.constant 0 : i32
    return %c0_i32, %c0_i32_0 : i32, i32
  }
  func.func @transform_5(%arg0: i32) -> (i32, i32) {
    %c0_i32 = arith.constant 0 : i32
    %c0_i32_0 = arith.constant 0 : i32
    %c0_i32_1 = arith.constant 0 : i32
    return %c0_i32, %c0_i32_0 : i32, i32
  }
  func.func @transform_6(%arg0: i32) -> (i32, i32) {
    %c0_i32 = arith.constant 0 : i32
    %c0_i32_0 = arith.constant 0 : i32
    %c0_i32_1 = arith.constant 0 : i32
    return %c0_i32, %c0_i32_0 : i32, i32
  }
  func.func @transform_7(%arg0: i32) -> (i32, i32) {
    %c0_i32 = arith.constant 0 : i32
    %c0_i32_0 = arith.constant 0 : i32
    return %arg0, %c0_i32 : i32, i32
  }
}

module attributes {stable_mosaic.version = 11 : i64} {
  func.func @_mlp2_kernel(%arg0: i32, %arg1: memref<16x16xf32, #tpu.memory_space<vmem>>, %arg2: memref<16x16xf32, #tpu.memory_space<vmem>>, %arg3: memref<16x128xbf16, #tpu.memory_space<vmem>>, %arg4: memref<16x128xbf16, #tpu.memory_space<vmem>>, %arg5: memref<1x128xf32, #tpu.memory_space<vmem>>, %arg6: memref<128x128xbf16, #tpu.memory_space<vmem>>, %arg7: memref<1x128xf32, #tpu.memory_space<vmem>>, %arg8: memref<16x128xbf16, #tpu.memory_space<vmem>>) attributes {dimension_semantics = [#tpu.dimension_semantics<parallel>], iteration_bounds = array<i64: 2>, scalar_prefetch = 0 : i64, scratch_operands = 0 : i64, tpu.core_type = #tpu.core_type<tc>, window_params = [{transform_indices = @transform_0, window_bounds = array<i64: 16, 16>}, {transform_indices = @transform_1, window_bounds = array<i64: 16, 16>}, {pipeline_mode = #tpu.pipeline_mode<synchronous>, transform_indices = @transform_2, window_bounds = array<i64: 16, 128>}, {pipeline_mode = #tpu.pipeline_mode<synchronous>, transform_indices = @transform_3, window_bounds = array<i64: 16, 128>}, {pipeline_mode = #tpu.pipeline_mode<synchronous>, transform_indices = @transform_4, window_bounds = array<i64: 1, 128>}, {pipeline_mode = #tpu.pipeline_mode<synchronous>, transform_indices = @transform_5, window_bounds = array<i64: 128, 128>}, {pipeline_mode = #tpu.pipeline_mode<synchronous>, transform_indices = @transform_6, window_bounds = array<i64: 1, 128>}, {transform_indices = @transform_7, window_bounds = array<i64: 16, 128>}]} {
    %c0 = arith.constant 0 : index
    %c0_0 = arith.constant 0 : index
    %0 = vector.load %arg1[%c0, %c0_0] : memref<16x16xf32, #tpu.memory_space<vmem>>, vector<16x16xf32>
    %1 = arith.truncf %0 : vector<16x16xf32> to vector<16x16xbf16>
    %c0_1 = arith.constant 0 : index
    %c0_2 = arith.constant 0 : index
    %2 = vector.load %arg2[%c0_1, %c0_2] : memref<16x16xf32, #tpu.memory_space<vmem>>, vector<16x16xf32>
    %3 = arith.truncf %2 : vector<16x16xf32> to vector<16x16xbf16>
    %c0_3 = arith.constant 0 : index
    %c0_4 = arith.constant 0 : index
    %4 = vector.load %arg3[%c0_3, %c0_4] : memref<16x128xbf16, #tpu.memory_space<vmem>>, vector<16x128xbf16>
    %cst = arith.constant dense<0.000000e+00> : vector<16x128xf32>
    %5 = tpu.matmul %1, %4, %cst {dimension_numbers = #tpu.dot_dimension_numbers<[1], [0], [0], [1], [0, 0, 1, 1], [], []>} : vector<16x16xbf16>, vector<16x128xbf16>, vector<16x128xf32> -> vector<16x128xf32>
    %c0_5 = arith.constant 0 : index
    %c0_6 = arith.constant 0 : index
    %6 = vector.load %arg4[%c0_5, %c0_6] : memref<16x128xbf16, #tpu.memory_space<vmem>>, vector<16x128xbf16>
    %cst_7 = arith.constant dense<0.000000e+00> : vector<16x128xf32>
    %7 = tpu.matmul %3, %6, %cst_7 {dimension_numbers = #tpu.dot_dimension_numbers<[1], [0], [0], [1], [0, 0, 1, 1], [], []>} : vector<16x16xbf16>, vector<16x128xbf16>, vector<16x128xf32> -> vector<16x128xf32>
    %8 = arith.addf %5, %7 : vector<16x128xf32>
    %c0_8 = arith.constant 0 : index
    %c0_9 = arith.constant 0 : index
    %9 = vector.load %arg5[%c0_8, %c0_9] : memref<1x128xf32, #tpu.memory_space<vmem>>, vector<1x128xf32>
    %10 = vector.broadcast %9 : vector<1x128xf32> to vector<16x128xf32>
    %11 = arith.addf %8, %10 : vector<16x128xf32>
    %cst_10 = arith.constant 0.000000e+00 : f32
    %12 = vector.broadcast %cst_10 : f32 to vector<16x128xf32>
    %13 = arith.maximumf %11, %12 : vector<16x128xf32>
    %14 = arith.truncf %13 : vector<16x128xf32> to vector<16x128xbf16>
    %c0_11 = arith.constant 0 : index
    %c0_12 = arith.constant 0 : index
    %15 = vector.load %arg6[%c0_11, %c0_12] : memref<128x128xbf16, #tpu.memory_space<vmem>>, vector<128x128xbf16>
    %cst_13 = arith.constant dense<0.000000e+00> : vector<16x128xf32>
    %16 = tpu.matmul %14, %15, %cst_13 {dimension_numbers = #tpu.dot_dimension_numbers<[1], [0], [0], [1], [0, 0, 1, 1], [], []>} : vector<16x128xbf16>, vector<128x128xbf16>, vector<16x128xf32> -> vector<16x128xf32>
    %c0_14 = arith.constant 0 : index
    %c0_15 = arith.constant 0 : index
    %17 = vector.load %arg7[%c0_14, %c0_15] : memref<1x128xf32, #tpu.memory_space<vmem>>, vector<1x128xf32>
    %18 = vector.broadcast %17 : vector<1x128xf32> to vector<16x128xf32>
    %19 = arith.addf %16, %18 : vector<16x128xf32>
    %cst_16 = arith.constant 0.000000e+00 : f32
    %20 = vector.broadcast %cst_16 : f32 to vector<16x128xf32>
    %21 = arith.maximumf %19, %20 : vector<16x128xf32>
    %22 = arith.truncf %21 : vector<16x128xf32> to vector<16x128xbf16>
    %c0_17 = arith.constant 0 : index
    %c0_18 = arith.constant 0 : index
    %23 = vector.load %arg8[%c0_17, %c0_18] : memref<16x128xbf16, #tpu.memory_space<vmem>>, vector<16x128xbf16>
    tpu.vector_store %arg8[%c0_17, %c0_18], %22 {strides = array<i32>} : memref<16x128xbf16, #tpu.memory_space<vmem>>, vector<16x128xbf16>,
    return
  }
  func.func @transform_0(%arg0: i32) -> (i32, i32) {
    %c0_i32 = arith.constant 0 : i32
    %c0_i32_0 = arith.constant 0 : i32
    return %arg0, %c0_i32 : i32, i32
  }
  func.func @transform_1(%arg0: i32) -> (i32, i32) {
    %c0_i32 = arith.constant 0 : i32
    %c0_i32_0 = arith.constant 0 : i32
    return %arg0, %c0_i32 : i32, i32
  }
  func.func @transform_2(%arg0: i32) -> (i32, i32) {
    %c0_i32 = arith.constant 0 : i32
    %c0_i32_0 = arith.constant 0 : i32
    %c0_i32_1 = arith.constant 0 : i32
    return %c0_i32, %c0_i32_0 : i32, i32
  }
  func.func @transform_3(%arg0: i32) -> (i32, i32) {
    %c0_i32 = arith.constant 0 : i32
    %c0_i32_0 = arith.constant 0 : i32
    %c0_i32_1 = arith.constant 0 : i32
    return %c0_i32, %c0_i32_0 : i32, i32
  }
  func.func @transform_4(%arg0: i32) -> (i32, i32) {
    %c0_i32 = arith.constant 0 : i32
    %c0_i32_0 = arith.constant 0 : i32
    %c0_i32_1 = arith.constant 0 : i32
    return %c0_i32, %c0_i32_0 : i32, i32
  }
  func.func @transform_5(%arg0: i32) -> (i32, i32) {
    %c0_i32 = arith.constant 0 : i32
    %c0_i32_0 = arith.constant 0 : i32
    %c0_i32_1 = arith.constant 0 : i32
    return %c0_i32, %c0_i32_0 : i32, i32
  }
  func.func @transform_6(%arg0: i32) -> (i32, i32) {
    %c0_i32 = arith.constant 0 : i32
    %c0_i32_0 = arith.constant 0 : i32
    %c0_i32_1 = arith.constant 0 : i32
    return %c0_i32, %c0_i32_0 : i32, i32
  }
  func.func @transform_7(%arg0: i32) -> (i32, i32) {
    %c0_i32 = arith.constant 0 : i32
    %c0_i32_0 = arith.constant 0 : i32
    return %arg0, %c0_i32 : i32, i32
  }
}

</mosaic_0001>

<bundles_post_ra>
// kernel: _forward.5
= control target key start
LH: loop header
LB: loop body
LE: loop exit
PB: predicated region body
PF: predicated region fallthrough
CT: control target
= control target key end

     0   :  { %vm287_vm0 = vcmask 1040384   ;;  %s627_s0 = inlined_call_operand.vmem [shape: f32[2,128], index: 0, kind: input, shape index: {}]   ;;  %s628_s1 = inlined_call_operand.vmem [shape: f32[2,128], index: 1, kind: input, shape index: {}]   ;;  %s629_s2 = inlined_call_operand.vmem [shape: bf16[128,128], index: 2, kind: input, shape index: {}]   ;;  %s630_s3 = inlined_call_operand.vmem [shape: bf16[128,128], index: 3, kind: input, shape index: {}]   ;;  %s631_s4 = inlined_call_operand.vmem [shape: f32[1,128], index: 4, kind: input, shape index: {}]   ;;  %s632_s5 = inlined_call_operand.vmem [shape: bf16[128,128], index: 5, kind: input, shape index: {}]   ;;  %s633_s6 = inlined_call_operand.vmem [shape: f32[1,128], index: 6, kind: input, shape index: {}]   ;;  %s634_s7 = inlined_call_operand.vmem [shape: bf16[2,128], index: 7, kind: output, shape index: {}]  }
   0x1   :  { %v483_v0 = vld [vmem:[%s630_s3 + $0x38] sm:$0xff]  ;;  %v482_v2 = vld [vmem:[%s630_s3 + $0x30] sm:$0xff]  ;;  %v481_v4 = vld [vmem:[%s630_s3 + $0x28] sm:$0xff] }
   0x2   :  { %v475_v1 = vld [vmem:[%s629_s2 + $0x38] sm:$0xff]  ;;  %112 = vmatpush.bf16.msra.mxu0 %v483_v0  ;;  %v474_v3 = vld [vmem:[%s629_s2 + $0x30] sm:$0xff]  ;;  %v473_v5 = vld [vmem:[%s629_s2 + $0x28] sm:$0xff] }
   0x3   :  { %174 = vmatpush.bf16.msra.mxu1 %v475_v1  ;;  %v491_v6 = vld [vmem:[%s632_s5 + $0x38] sm:$0xff]  ;;  %v490_v7 = vld [vmem:[%s632_s5 + $0x30] sm:$0xff]  ;;  %v480_v8 = vld [vmem:[%s630_s3 + $0x20] sm:$0xff] }
   0x4   :  { %265 = vmatpush.bf16.msra.mxu2 %v491_v6  ;;  %v472_v9 = vld [vmem:[%s629_s2 + $0x20] sm:$0xff]  ;;  %v489_v10 = vld [vmem:[%s632_s5 + $0x28] sm:$0xff]  ;;  %v479_v11 = vld [vmem:[%s630_s3 + $0x18] sm:$0xff] }
   0x5   :  { %v471_v12 = vld [vmem:[%s629_s2 + $0x18] sm:$0xff]  ;;  %v488_v13 = vld [vmem:[%s632_s5 + $0x20] sm:$0xff]  ;;  %v478_v14 = vld [vmem:[%s630_s3 + $0x10] sm:$0xff] }
   0x6   :  { %113 = vmatpush.bf16.msra.mxu0 %v482_v2  ;;  %v470_v15 = vld [vmem:[%s629_s2 + $0x10] sm:$0xff]  ;;  %v477_v16 = vld [vmem:[%s630_s3 + $0x8] sm:$0xff]  ;;  %v476_v18 = vld [vmem:[%s630_s3] sm:$0xff] }
   0x7   :  { %175 = vmatpush.bf16.msra.mxu1 %v474_v3  ;;  %v469_v17 = vld [vmem:[%s629_s2 + $0x8] sm:$0xff]  ;;  %v468_v19 = vld [vmem:[%s629_s2] sm:$0xff]  ;;  %v487_v26 = vld [vmem:[%s632_s5 + $0x18] sm:$0xff] }
   0x8   :  { %266 = vmatpush.bf16.msra.mxu2 %v490_v7  ;;  %v29_v20 = vld [vmem:[%s628_s1] sm:$0xff]  ;;  %v30_v21 = vld [vmem:[%s628_s1 + $0x8] sm:$0xff]  ;;  %v486_v27 = vld [vmem:[%s632_s5 + $0x10] sm:$0xff] }
   0x9   :  { %v26_v22 = vld [vmem:[%s627_s0] sm:$0xff]  ;;  %v27_v23 = vld [vmem:[%s627_s0 + $0x8] sm:$0xff]  ;;  %v31_v24 = vpack.c.bf16 %v30_v21, %v29_v20 }
   0xa   :  { %114 = vmatpush.bf16.msra.mxu0 %v481_v4  ;;  %v28_v25 = vpack.c.bf16 %v27_v23, %v26_v22  ;;  %v485_v28 = vld [vmem:[%s632_s5 + $0x8] sm:$0xff]  ;;  %v484_v29 = vld [vmem:[%s632_s5] sm:$0xff] }
   0xb   :  { %176 = vmatpush.bf16.msra.mxu1 %v473_v5  ;;  %v492_v33 = vld [vmem:[%s631_s4] ss:$0 sm:$0xff] }
   0xc   :  { %267 = vmatpush.bf16.msra.mxu2 %v489_v10  ;;  %v493_v42 = vld [vmem:[%s633_s6] ss:$0 sm:$0xff] }
   0xe   :  { %115 = vmatpush.bf16.msra.mxu0 %v480_v8 }
   0xf   :  { %177 = vmatpush.bf16.msra.mxu1 %v472_v9 }
  0x10   :  { %268 = vmatpush.bf16.msra.mxu2 %v488_v13 }
  0x12   :  { %116 = vmatpush.bf16.msra.mxu0 %v479_v11 }
  0x13   :  { %178 = vmatpush.bf16.msra.mxu1 %v471_v12 }
  0x14   :  { %269 = vmatpush.bf16.msra.mxu2 %v487_v26 }
  0x16   :  { %117 = vmatpush.bf16.msra.mxu0 %v478_v14 }
  0x17   :  { %179 = vmatpush.bf16.msra.mxu1 %v470_v15 }
  0x18   :  { %270 = vmatpush.bf16.msra.mxu2 %v486_v27 }
  0x1a   :  { %118 = vmatpush.bf16.msra.mxu0 %v477_v16 }
  0x1b   :  { %180 = vmatpush.bf16.msra.mxu1 %v469_v17 }
  0x1c   :  { %271 = vmatpush.bf16.msra.mxu2 %v485_v28 }
  0x1e   :  { %119 = vmatpush.bf16.msra.mxu0 %v476_v18 }
  0x1f   :  { %181 = vmatpush.bf16.msra.mxu1 %v468_v19 }
  0x20   :  { %272 = vmatpush.bf16.msra.mxu2 %v484_v29 }
  0x21   :  { %120 = vmatmul.bf16.vlgmr.msra.gmra.mxu0 %v31_v24 }
  0x22   :  { %182 = vmatmul.bf16.vlgmr.msra.gmra.mxu1 %v28_v25 }
  0x9e   :  { %v121_v30 = vpop.f32.mrf.mxu0 }
  0x9f   :  { %v183_v31 = vpop.f32.mrf.mxu1 }
  0xa0   :  { %v184_v32 = vadd.f32 %v183_v31, %v121_v30 }
  0xa2   :  { %v192_v36 = vadd.f32 %v492_v33, %v184_v32 }
  0xa4   :  { %v194_v39 = vmax.f32 %v192_v36, 0.0 }
  0xa6   :  { %v123_v34 = vpop.f32.mrf.mxu0 }
  0xa7   :  { %v185_v35 = vpop.f32.mrf.mxu1 }
  0xa8   :  { %v186_v37 = vadd.f32 %v185_v35, %v123_v34 }
  0xaa   :  { %v193_v38 = vadd.f32 %v492_v33, %v186_v37 }
  0xac   :  { %v195_v40 = vmax.f32 %v193_v38, 0.0 }
  0xae   :  { %v196_v41 = vpack.c.bf16 %v195_v40, %v194_v39 }
  0xb0   :  { %273 = vmatmul.bf16.vlgmr.msra.gmra.mxu2 %v196_v41 }
 0x133   :  { %v274_v43 = vpop.f32.mrf.mxu2 }
 0x134   :  { %v275_v44 = vadd.f32 %v493_v42, %v274_v43 }
 0x136   :  { %v279_v45 = vmax.f32 %v275_v44, 0.0 }
 0x138   :  { %v281_v46 = vpack.c.bf16 %v279_v45, %v279_v45 }
 0x13a   :  { %v285_v47 = vrot.slane %v281_v46, 3 }
 0x13b   :  { %v276_v48 = vpop.f32.mrf.mxu2 }
 0x13c   :  { %v290_v49 = vsel %vm287_vm0, %v281_v46, %v285_v47 }
 0x13d   :  { %323 = vst [vmem:[#allocation2] sm:$0x1] %v290_v49 }
 0x144   :  { %v349_v50 = vld [vmem:[#allocation2] sm:$0x1] }
 0x145   :  { %350 = vst [vmem:[%s634_s7] sm:$0x1] %v349_v50 }

// kernel: _forward.3
= control target key start
LH: loop header
LB: loop body
LE: loop exit
PB: predicated region body
PF: predicated region fallthrough
CT: control target
= control target key end

     0   :  { %s519_s18 = smov 0   ;;  %s573_s0 = inlined_call_operand.vmem [shape: f32[32,16], index: 0, kind: input, shape index: {}]   ;;  %s574_s1 = inlined_call_operand.vmem [shape: bf16[16,128], index: 1, kind: input, shape index: {}]   ;;  %s575_s2 = inlined_call_operand.vmem [shape: f32[1,128], index: 2, kind: input, shape index: {}]   ;;  %s576_s3 = inlined_call_operand.vmem [shape: bf16[128,128], index: 3, kind: input, shape index: {}]   ;;  %s577_s4 = inlined_call_operand.vmem [shape: f32[1,128], index: 4, kind: input, shape index: {}]   ;;  %s578_s5 = inlined_call_operand.vmem [shape: bf16[32,128], index: 5, kind: output, shape index: {}]  }
   0x1 LB: > { %s409_s19 = sadd.s32 4294967295, %s487_s18   ;;  %p413_p0 = scmp.ge.s32.totalorder %s487_s18, 1  ;;  %s487_s18 = sphi %s519_s18, %s15_s18  }
   0x2   : > { %p188_p1 = scmp.lt.s32.totalorder %s487_s18, 3 }
   0x4   : > { %p189_p2 = pnand %p413_p0, %p188_p1 }
   0x5   : > { %s414_s22 = sshll.u32 (!%p189_p2), %s409_s19, 1 }
   0x6   : > { %192 = sbr.rel (%p189_p2) target bundleno = 298 (0x12a), region = 40  ;;  %p217_p3 = scmp.lt.s32.totalorder (!%p189_p2), %s414_s22, 3 }
   0xb   : > { %v457_v0 = vld [vmem:[%s574_s1] sm:$0xff]  ;;  %v465_v1 = vld [vmem:[%s576_s3 + $0x38] sm:$0xff]  ;;  %v464_v2 = vld [vmem:[%s576_s3 + $0x30] sm:$0xff]  ;;  %s580_s22 = smov (!%p217_p3, %s414_s22), 3  ;;  %vm244_vm0 = vcmask 130048  }
   0xc   : > { %255 = vmatpush.bf16.msra.mxu0 %v457_v0  ;;  %333 = vmatpush.bf16.msra.mxu1 %v465_v1  ;;  %s415_s27 = sshll.u32 %s580_s22, 3  ;;  %v463_v3 = vld [vmem:[%s576_s3 + $0x28] sm:$0xff]  ;;  %v462_v7 = vld [vmem:[%s576_s3 + $0x20] sm:$0xff]  ;;  %v461_v8 = vld [vmem:[%s576_s3 + $0x18] sm:$0xff]  ;;  %s417_s24 = sshll.u32 %s580_s22, 2 }
   0xd   : > { %s220_s30 = scalar_lea.vmem %s573_s0, %s415_s27  ;;  %v460_v9 = vld [vmem:[%s576_s3 + $0x10] sm:$0xff]  ;;  %v459_v10 = vld [vmem:[%s576_s3 + $0x8] sm:$0xff]  ;;  %v458_v11 = vld [vmem:[%s576_s3] sm:$0xff]  ;;  %s226_s27 = scalar_lea.vmem %s578_s5, %s417_s24 }
   0xe   : > { %v229_v4 = vld [vmem:[%s220_s30] sm:$0xff]  ;;  %v230_v5 = vld [vmem:[%s220_s30 + $0x8] sm:$0xff] }
   0xf   : > { %v231_v6 = vpack.c.bf16 %v230_v5, %v229_v4  ;;  %v479_v13 = vld [vmem:[%s575_s2] ss:$0 sm:$0xff] }
  0x10   : > { %334 = vmatpush.bf16.msra.mxu1 %v464_v2  ;;  %v480_v21 = vld [vmem:[%s577_s4] ss:$0 sm:$0xff] }
  0x11   : > { %422 = vmatmul.msk.bf16.vlgmr.msra.gmra.mxu0 %vm244_vm0, %v231_v6 }
  0x14   : > { %335 = vmatpush.bf16.msra.mxu1 %v463_v3 }
  0x18   : > { %336 = vmatpush.bf16.msra.mxu1 %v462_v7 }
  0x1c   : > { %337 = vmatpush.bf16.msra.mxu1 %v461_v8 }
  0x20   : > { %338 = vmatpush.bf16.msra.mxu1 %v460_v9 }
  0x24   : > { %339 = vmatpush.bf16.msra.mxu1 %v459_v10 }
  0x28   : > { %340 = vmatpush.bf16.msra.mxu1 %v458_v11 }
  0x8e   : > { %v257_v12 = vpop.f32.mrf.mxu0 }
  0x8f   : > { %v258_v14 = vadd.f32 %v479_v13, %v257_v12 }
  0x91   : > { %v262_v17 = vmax.f32 %v258_v14, 0.0 }
  0x96   : > { %v259_v15 = vpop.f32.mrf.mxu0 }
  0x97   : > { %v260_v16 = vadd.f32 %v479_v13, %v259_v15 }
  0x99   : > { %v263_v18 = vmax.f32 %v260_v16, 0.0 }
  0x9b   : > { %v264_v19 = vpack.c.bf16 %v263_v18, %v262_v17 }
  0x9d   : > { %341 = vmatmul.bf16.vlgmr.msra.gmra.mxu1 %v264_v19 }
 0x11a   : > { %v342_v20 = vpop.f32.mrf.mxu1 }
 0x11b   : > { %v343_v22 = vadd.f32 %v480_v21, %v342_v20 }
 0x11d   : > { %v347_v25 = vmax.f32 %v343_v22, 0.0 }
 0x122   : > { %v344_v23 = vpop.f32.mrf.mxu1 }
 0x123   : > { %v345_v24 = vadd.f32 %v480_v21, %v344_v23 }
 0x125   : > { %v348_v26 = vmax.f32 %v345_v24, 0.0 }
 0x127   : > { %v469_v27 = vpack.c.bf16 %v348_v26, %v347_v25 }
 0x129   : > { %470 = vst [vmem:[%s226_s27] sm:$0xff] %v469_v27  }
 0x12a PF: > { %s15_s18 = sadd.s32 1, %s487_s18  }
 0x12b   : > { %p12_p4 = scmp.ge.s32.totalorder %s15_s18, 4  }
 0x12d   :  { %14 = sbr.rel (!%p12_p4) target bundleno = 1 (0x1), region = 70 }

// kernel: _forward.4
= control target key start
LH: loop header
LB: loop body
LE: loop exit
PB: predicated region body
PF: predicated region fallthrough
CT: control target
= control target key end

     0   :  { %s655_s24 = smov 0   ;;  %s715_s0 = inlined_call_operand.vmem [shape: f32[32,16], index: 0, kind: input, shape index: {}]   ;;  %s716_s1 = inlined_call_operand.vmem [shape: f32[32,16], index: 1, kind: input, shape index: {}]   ;;  %s717_s2 = inlined_call_operand.vmem [shape: bf16[16,128], index: 2, kind: input, shape index: {}]   ;;  %s718_s3 = inlined_call_operand.vmem [shape: bf16[16,128], index: 3, kind: input, shape index: {}]   ;;  %s719_s4 = inlined_call_operand.vmem [shape: f32[1,128], index: 4, kind: input, shape index: {}]   ;;  %s720_s5 = inlined_call_operand.vmem [shape: bf16[128,128], index: 5, kind: input, shape index: {}]   ;;  %s721_s6 = inlined_call_operand.vmem [shape: f32[1,128], index: 6, kind: input, shape index: {}]   ;;  %s722_s7 = inlined_call_operand.vmem [shape: bf16[32,128], index: 7, kind: output, shape index: {}]  }
   0x1 LB: > { %s527_s25 = sadd.s32 4294967295, %s613_s24   ;;  %p531_p0 = scmp.ge.s32.totalorder %s613_s24, 1  ;;  %s613_s24 = sphi %s655_s24, %s17_s24  }
   0x2   : > { %p249_p1 = scmp.lt.s32.totalorder %s613_s24, 3 }
   0x4   : > { %p250_p2 = pnand %p531_p0, %p249_p1 }
   0x5   : > { %s532_s30 = sshll.u32 (!%p250_p2), %s527_s25, 1 }
   0x6   : > { %253 = sbr.rel (%p250_p2) target bundleno = 307 (0x133), region = 48  ;;  %p287_p3 = scmp.lt.s32.totalorder (!%p250_p2), %s532_s30, 3 }
   0xb   : > { %v583_v0 = vld [vmem:[%s718_s3] sm:$0xff]  ;;  %v591_v2 = vld [vmem:[%s720_s5 + $0x38] sm:$0xff]  ;;  %s724_s30 = smov (!%p287_p3, %s532_s30), 3  ;;  %v590_v3 = vld [vmem:[%s720_s5 + $0x30] sm:$0xff]  ;;  %vm321_vm0 = vcmask 130048  }
   0xc   : > { %v582_v1 = vld [vmem:[%s717_s2] sm:$0xff]  ;;  %332 = vmatpush.bf16.msra.mxu0 %v583_v0  ;;  %439 = vmatpush.bf16.msra.mxu2 %v591_v2  ;;  %s533_s12 = sshll.u32 %s724_s30, 3  ;;  %v589_v4 = vld [vmem:[%s720_s5 + $0x28] sm:$0xff]  ;;  %v587_v12 = vld [vmem:[%s720_s5 + $0x18] sm:$0xff]  ;;  %s537_s14 = sshll.u32 %s724_s30, 2 }
   0xd   : > { %355 = vmatpush.bf16.msra.mxu1 %v582_v1  ;;  %s296_s15 = scalar_lea.vmem %s716_s1, %s533_s12  ;;  %s290_s18 = scalar_lea.vmem %s715_s0, %s533_s12  ;;  %v588_v11 = vld [vmem:[%s720_s5 + $0x20] sm:$0xff]  ;;  %v586_v13 = vld [vmem:[%s720_s5 + $0x10] sm:$0xff]  ;;  %v585_v14 = vld [vmem:[%s720_s5 + $0x8] sm:$0xff] }
   0xe   : > { %v308_v5 = vld [vmem:[%s296_s15] sm:$0xff]  ;;  %v309_v6 = vld [vmem:[%s296_s15 + $0x8] sm:$0xff]  ;;  %s302_s17 = scalar_lea.vmem %s722_s7, %s537_s14 }
   0xf   : > { %v305_v7 = vld [vmem:[%s290_s18] sm:$0xff]  ;;  %v310_v8 = vpack.c.bf16 %v309_v6, %v308_v5  ;;  %v306_v9 = vld [vmem:[%s290_s18 + $0x8] sm:$0xff] }
  0x10   : > { %440 = vmatpush.bf16.msra.mxu2 %v590_v3  ;;  %v307_v10 = vpack.c.bf16 %v306_v9, %v305_v7  ;;  %v584_v15 = vld [vmem:[%s720_s5] sm:$0xff] }
  0x11   : > { %542 = vmatmul.msk.bf16.vlgmr.msra.gmra.mxu0 %vm321_vm0, %v310_v8  ;;  %v605_v19 = vld [vmem:[%s719_s4] ss:$0 sm:$0xff] }
  0x12   : > { %547 = vmatmul.msk.bf16.vlgmr.msra.gmra.mxu1 %vm321_vm0, %v307_v10  ;;  %v606_v29 = vld [vmem:[%s721_s6] ss:$0 sm:$0xff] }
  0x14   : > { %441 = vmatpush.bf16.msra.mxu2 %v589_v4 }
  0x18   : > { %442 = vmatpush.bf16.msra.mxu2 %v588_v11 }
  0x1c   : > { %443 = vmatpush.bf16.msra.mxu2 %v587_v12 }
  0x20   : > { %444 = vmatpush.bf16.msra.mxu2 %v586_v13 }
  0x24   : > { %445 = vmatpush.bf16.msra.mxu2 %v585_v14 }
  0x28   : > { %446 = vmatpush.bf16.msra.mxu2 %v584_v15 }
  0x8e   : > { %v334_v16 = vpop.f32.mrf.mxu0 }
  0x8f   : > { %v357_v17 = vpop.f32.mrf.mxu1 }
  0x90   : > { %v358_v18 = vadd.f32 %v357_v17, %v334_v16 }
  0x92   : > { %v366_v22 = vadd.f32 %v605_v19, %v358_v18 }
  0x94   : > { %v368_v25 = vmax.f32 %v366_v22, 0.0 }
  0x96   : > { %v336_v20 = vpop.f32.mrf.mxu0 }
  0x97   : > { %v359_v21 = vpop.f32.mrf.mxu1 }
  0x98   : > { %v360_v23 = vadd.f32 %v359_v21, %v336_v20 }
  0x9a   : > { %v367_v24 = vadd.f32 %v605_v19, %v360_v23 }
  0x9c   : > { %v369_v26 = vmax.f32 %v367_v24, 0.0 }
  0x9e   : > { %v370_v27 = vpack.c.bf16 %v369_v26, %v368_v25 }
  0xa0   : > { %447 = vmatmul.bf16.vlgmr.msra.gmra.mxu2 %v370_v27 }
 0x123   : > { %v448_v28 = vpop.f32.mrf.mxu2 }
 0x124   : > { %v449_v30 = vadd.f32 %v606_v29, %v448_v28 }
 0x126   : > { %v453_v33 = vmax.f32 %v449_v30, 0.0 }
 0x12b   : > { %v450_v31 = vpop.f32.mrf.mxu2 }
 0x12c   : > { %v451_v32 = vadd.f32 %v606_v29, %v450_v31 }
 0x12e   : > { %v454_v34 = vmax.f32 %v451_v32, 0.0 }
 0x130   : > { %v595_v35 = vpack.c.bf16 %v454_v34, %v453_v33 }
 0x132   : > { %596 = vst [vmem:[%s302_s17] sm:$0xff] %v595_v35  }
 0x133 PF: > { %s17_s24 = sadd.s32 1, %s613_s24  }
 0x134   : > { %p14_p4 = scmp.ge.s32.totalorder %s17_s24, 4  }
 0x136   :  { %16 = sbr.rel (!%p14_p4) target bundleno = 1 (0x1), region = 81 }

</bundles_post_ra>
